<compile_context>
chip_gen: v6e
topology: v6e:2x2x1
jax: 0.10.0
libtpu: 0.0.40
codegen_flags: <defaults>
</compile_context>

<pallas_src>
import functools

import jax
import jax.numpy as jnp
from jax.experimental import pallas as pl
from jax.experimental.pallas import tpu as pltpu


def _cdiv(a, b):
    return -(-a // b)


def _round_up(a, b):
    return _cdiv(a, b) * b


def _mfe_loss_kernel(x_ref, t_ref, fpe_ref, fne_ref, oth_ref, *,
                     C, others_idx, happy_idx, sad_idx, angry_idx):
    """Grid = (core, batch_chunk); accumulates per-core (1, 8, 128) partials."""
    step = pl.program_id(1)                       # inner "arbitrary" batch axis

    @pl.when(step == 0)
    def _init():
        fpe_ref[...] = jnp.zeros_like(fpe_ref)
        fne_ref[...] = jnp.zeros_like(fne_ref)
        oth_ref[...] = jnp.zeros_like(oth_ref)

    t = t_ref[...]                                # (TBR, 128) int32 labels
    # Per-class logit slabs: static leading-dim loads, each a dense (TBR, 128)
    # tile (full vregs). Cast to f32 in-kernel (inputs are DMA'd in native
    # dtype -> half the HBM traffic for bf16 models; f32 math keeps v5e happy).
    rows = [x_ref[i].astype(jnp.float32) for i in range(C)]

    # Softmax over classes via explicit pairwise combines — the class axis
    # never touches the XLU (pure VPU max/add, EUP exp/reciprocal).
    m = rows[0]
    for r in rows[1:]:
        m = jnp.maximum(m, r)
    e_rows = [jnp.exp(r - m) for r in rows]
    denom = e_rows[0]
    for e in e_rows[1:]:
        denom = denom + e
    inv = pl.reciprocal(denom, approx=True)       # EUP slot (nearly free)
    inv = inv * (2.0 - denom * inv)               # one Newton step -> ~f32 exact

    p_o = e_rows[others_idx] * inv
    p_h = e_rows[happy_idx] * inv
    p_s = e_rows[sad_idx] * inv
    p_a = e_rows[angry_idx] * inv
    p2_h, p2_s, p2_a = p_h * p_h, p_s * p_s, p_a * p_a

    is_o = t == others_idx
    is_h = t == happy_idx
    is_s = t == sad_idx
    is_e = jnp.logical_not(is_o | is_h | is_s)    # PyTorch else-branch

    # FNE: only 'others' rows contribute (p_others - 1)^2.
    fne_terms = jnp.where(is_o, (p_o - 1.0) ** 2, 0.0)
    # FPE: S3 minus the true-class square ('others' rows keep the full S3).
    s3 = p2_h + p2_s + p2_a
    fpe_terms = (s3
                 - jnp.where(is_h, p2_h, 0.0)
                 - jnp.where(is_s, p2_s, 0.0)
                 - jnp.where(is_e, p2_a, 0.0))

    def _fold(v):
        # (TBR, 128) -> (8, 128): vreg adds over the major axis only; no
        # cross-lane/XLU reduction inside the grid loop.
        return jnp.sum(v.reshape(-1, 8, 128), axis=0)

    fpe_ref[...] += _fold(fpe_terms)[None]
    fne_ref[...] += _fold(fne_terms)[None]
    oth_ref[...] += _fold(is_o.astype(jnp.float32))[None]


def modified_mfe_loss(outputs, target, *, alpha, others_idx, happy_idx,
                      sad_idx, angry_idx, block_rows=None, num_cores=2,
                      tile_budget_bytes=4 * 1024 * 1024):
    """outputs: (B, C) logits (any float dtype); target: (B,) int labels -> scalar loss.

    Precondition (same as the PyTorch module): at least one row with
    target == others_idx, otherwise fne_num == 0 and the result is inf/nan
    (the PyTorch loop would raise instead).
    """
    B, C = outputs.shape
    LANES, SUB = 128, 8

    # ---- tile sizing (per-generation safe) ---------------------------------
    itemsize = jnp.dtype(outputs.dtype).itemsize
    bytes_per_row = LANES * (C * itemsize + 4)          # logits + int32 targets
    rows_needed = _cdiv(B, LANES)                       # 128-wide batch rows
    per_core_rows = _round_up(_cdiv(rows_needed, num_cores), SUB)

    if block_rows is None:
        # ~tile_budget_bytes of inputs per grid step (Pallas double-buffers).
        # Default 4 MiB -> ~200K batch elems/step for f32 x 4 classes; the
        # double-buffered footprint stays well under v5e's 16 MiB scoped VMEM
        # default and v7x's 64 MiB physical VMEM.
        block_rows = (tile_budget_bytes // bytes_per_row) // SUB * SUB
    block_rows = max(SUB, min(int(block_rows) // SUB * SUB, per_core_rows))
    nb = _cdiv(rows_needed, num_cores * block_rows)     # batch chunks per core
    # Shrink the tile to the actual need so trailing padding stays < one tile.
    block_rows = _round_up(_cdiv(rows_needed, num_cores * nb), SUB)
    R = num_cores * nb * block_rows                     # padded 128-wide rows
    B_pad = R * LANES
    npad = B_pad - B

    # ---- padding: synthetic one-hot 'others' rows (zero contribution) ------
    t_i32 = target.astype(jnp.int32)
    if npad > 0:
        # Softmax of [0, -1e4, ...] is exactly one-hot (exp(-1e4) underflows
        # to 0): fne term (p_o-1)^2 ~ 0, fpe term = 0.  These rows only bump
        # the 'others' counter, corrected below with the static npad.  This
        # removes all per-element validity masking from the kernel.
        pad_x = jnp.full((npad, C), -1e4, dtype=outputs.dtype)
        pad_x = pad_x.at[:, others_idx].set(0)
        x_full = jnp.concatenate([outputs, pad_x], axis=0)
        t_full = jnp.concatenate(
            [t_i32, jnp.full((npad,), others_idx, dtype=jnp.int32)])
    else:
        x_full, t_full = outputs, t_i32

    # Batch fills both vreg axes: (B_pad, C) -> (C, R, 128); targets -> (R, 128).
    # TODO(synk): a producer that already emits class-major (C, B) logits would
    # remove this transpose entirely; allow_input_fusion below lets XLA fuse it
    # into the pallas_call operand instead of materializing an extra HBM pass.
    x_cbl = x_full.T.reshape(C, R, LANES)
    t_rl = t_full.reshape(R, LANES)

    kernel = functools.partial(
        _mfe_loss_kernel, C=C,
        others_idx=int(others_idx), happy_idx=int(happy_idx),
        sad_idx=int(sad_idx), angry_idx=int(angry_idx))

    part_shape = jax.ShapeDtypeStruct((num_cores, SUB, LANES), jnp.float32)
    fpe_p, fne_p, oth_p = pl.pallas_call(
        kernel,
        out_shape=(part_shape, part_shape, part_shape),
        grid=(num_cores, nb),
        in_specs=[
            pl.BlockSpec((C, block_rows, LANES),
                         lambda c, i: (0, c * nb + i, 0)),
            pl.BlockSpec((block_rows, LANES),
                         lambda c, i: (c * nb + i, 0)),
        ],
        out_specs=(
            pl.BlockSpec((1, SUB, LANES), lambda c, i: (c, 0, 0)),
            pl.BlockSpec((1, SUB, LANES), lambda c, i: (c, 0, 0)),
            pl.BlockSpec((1, SUB, LANES), lambda c, i: (c, 0, 0)),
        ),
        compiler_params=pltpu.CompilerParams(
            # Leading axis splits the batch across v7x's two TensorCores;
            # the trailing axis is the per-core streaming reduction.
            dimension_semantics=("parallel", "arbitrary"),
            allow_input_fusion=[True, True],
            vmem_limit_bytes=32 * 1024 * 1024,
        ),
    )(x_cbl, t_rl)

    # Final scalar collapse and the fpe_num/fne_num division stay in the
    # wrapper (tiny XLA ops) so each core only emits resident partials.
    fpe_sum = jnp.sum(fpe_p)
    fne_sum = jnp.sum(fne_p)
    n_others = jnp.sum(oth_p) - float(npad)   # drop synthetic padded rows
    fne_num = n_others                        # precondition: >= 1 real 'others'
    fpe_num = 2.0 * B + n_others              # every row adds 2, 'others' +1 more
    return (alpha / 3.0) * (fpe_sum / fpe_num) + alpha * (fne_sum / fne_num)


if __name__ == "__main__":
    # Deterministic "parameters" of the module.
    alpha = 2.0
    others_idx, happy_idx, sad_idx, angry_idx = 0, 1, 2, 3

    B, C = 2500, 4        # not a multiple of 128 -> exercises the padding path
    k_out, k_tgt = jax.random.split(jax.random.PRNGKey(0))
    outputs = jax.random.normal(k_out, (B, C), dtype=jnp.float32)
    target = jax.random.randint(k_tgt, (B,), 0, C, dtype=jnp.int32)
    # Ensure at least one 'others' sample so fne_num > 0 (same implicit
    # precondition as the PyTorch module).
    target = target.at[0].set(others_idx)

    loss = modified_mfe_loss(
        outputs, target, alpha=alpha,
        others_idx=others_idx, happy_idx=happy_idx,
        sad_idx=sad_idx, angry_idx=angry_idx,
        block_rows=8)     # small tile -> grid (2, 2): exercises accumulation,
                          # both per-core output blocks, and the pad correction
    loss = jax.block_until_ready(loss)

    # Pure-Python reference replicating the original forward() loop.
    import numpy as np
    p = np.asarray(jax.nn.softmax(outputs.astype(jnp.float32), axis=1))
    t = np.asarray(target)
    fpe = fne = 0.0
    fpe_num = fne_num = 0
    for i in range(B):
        if t[i] == others_idx:
            fne += (p[i, others_idx] - 1.0) ** 2
            fpe += p[i, happy_idx] ** 2 + p[i, sad_idx] ** 2 + p[i, angry_idx] ** 2
            fne_num += 1
            fpe_num += 3
        elif t[i] == happy_idx:
            fpe += p[i, sad_idx] ** 2 + p[i, angry_idx] ** 2
            fpe_num += 2
        elif t[i] == sad_idx:
            fpe += p[i, happy_idx] ** 2 + p[i, angry_idx] ** 2
            fpe_num += 2
        else:
            fpe += p[i, sad_idx] ** 2 + p[i, happy_idx] ** 2
            fpe_num += 2
    ref = alpha / 3.0 * (fpe / fpe_num) + alpha * (fne / fne_num)

    assert abs(float(loss) - float(ref)) < 1e-4, (float(loss), float(ref))
    print("KERNEL_OK")
</pallas_src>

<mosaic_0001>
module attributes {stable_mosaic.version = 11 : i64} {
  func.func @_mfe_loss_kernel(%arg0: i32, %arg1: i32, %arg2: memref<4x8x128xf32, #tpu.memory_space<vmem>>, %arg3: memref<8x128xi32, #tpu.memory_space<vmem>>, %arg4: memref<1x8x128xf32, #tpu.memory_space<vmem>>, %arg5: memref<1x8x128xf32, #tpu.memory_space<vmem>>, %arg6: memref<1x8x128xf32, #tpu.memory_space<vmem>>) attributes {dimension_semantics = [#tpu.dimension_semantics<parallel>, #tpu.dimension_semantics<arbitrary>], iteration_bounds = array<i64: 2, 2>, scalar_prefetch = 0 : i64, scratch_operands = 0 : i64, tpu.core_type = #tpu.core_type<tc>, window_params = [{transform_indices = @transform_0, window_bounds = array<i64: 4, 8, 128>}, {transform_indices = @transform_1, window_bounds = array<i64: 8, 128>}, {transform_indices = @transform_2, window_bounds = array<i64: 1, 8, 128>}, {transform_indices = @transform_3, window_bounds = array<i64: 1, 8, 128>}, {transform_indices = @transform_4, window_bounds = array<i64: 1, 8, 128>}]} {
    %c0_i32 = arith.constant 0 : i32
    %0 = arith.cmpi eq, %arg1, %c0_i32 : i32
    %1 = arith.extui %0 : i1 to i32
    %c0_i32_0 = arith.constant 0 : i32
    %2 = arith.cmpi ne, %1, %c0_i32_0 : i32
    scf.if %2 {
      %cst_39 = arith.constant 0.000000e+00 : f32
      %83 = vector.broadcast %cst_39 : f32 to vector<1x8x128xf32>
      %c0_40 = arith.constant 0 : index
      %c0_41 = arith.constant 0 : index
      %c0_42 = arith.constant 0 : index
      %84 = vector.load %arg4[%c0_40, %c0_41, %c0_42] : memref<1x8x128xf32, #tpu.memory_space<vmem>>, vector<1x8x128xf32>
      tpu.vector_store %arg4[%c0_40, %c0_41, %c0_42], %83 {strides = array<i32>} : memref<1x8x128xf32, #tpu.memory_space<vmem>>, vector<1x8x128xf32>,
      %cst_43 = arith.constant 0.000000e+00 : f32
      %85 = vector.broadcast %cst_43 : f32 to vector<1x8x128xf32>
      %c0_44 = arith.constant 0 : index
      %c0_45 = arith.constant 0 : index
      %c0_46 = arith.constant 0 : index
      %86 = vector.load %arg5[%c0_44, %c0_45, %c0_46] : memref<1x8x128xf32, #tpu.memory_space<vmem>>, vector<1x8x128xf32>
      tpu.vector_store %arg5[%c0_44, %c0_45, %c0_46], %85 {strides = array<i32>} : memref<1x8x128xf32, #tpu.memory_space<vmem>>, vector<1x8x128xf32>,
      %cst_47 = arith.constant 0.000000e+00 : f32
      %87 = vector.broadcast %cst_47 : f32 to vector<1x8x128xf32>
      %c0_48 = arith.constant 0 : index
      %c0_49 = arith.constant 0 : index
      %c0_50 = arith.constant 0 : index
      %88 = vector.load %arg6[%c0_48, %c0_49, %c0_50] : memref<1x8x128xf32, #tpu.memory_space<vmem>>, vector<1x8x128xf32>
      tpu.vector_store %arg6[%c0_48, %c0_49, %c0_50], %87 {strides = array<i32>} : memref<1x8x128xf32, #tpu.memory_space<vmem>>, vector<1x8x128xf32>,
    } else {
    }
    %c0 = arith.constant 0 : index
    %c0_1 = arith.constant 0 : index
    %3 = vector.load %arg3[%c0, %c0_1] : memref<8x128xi32, #tpu.memory_space<vmem>>, vector<8x128xi32>
    %c0_2 = arith.constant 0 : index
    %c0_3 = arith.constant 0 : index
    %c0_4 = arith.constant 0 : index
    %4 = vector.load %arg2[%c0_2, %c0_3, %c0_4] : memref<4x8x128xf32, #tpu.memory_space<vmem>>, vector<1x8x128xf32>
    %5 = vector.shape_cast %4 : vector<1x8x128xf32> to vector<8x128xf32>
    %c1 = arith.constant 1 : index
    %c0_5 = arith.constant 0 : index
    %c0_6 = arith.constant 0 : index
    %6 = vector.load %arg2[%c1, %c0_5, %c0_6] : memref<4x8x128xf32, #tpu.memory_space<vmem>>, vector<1x8x128xf32>
    %7 = vector.shape_cast %6 : vector<1x8x128xf32> to vector<8x128xf32>
    %c2 = arith.constant 2 : index
    %c0_7 = arith.constant 0 : index
    %c0_8 = arith.constant 0 : index
    %8 = vector.load %arg2[%c2, %c0_7, %c0_8] : memref<4x8x128xf32, #tpu.memory_space<vmem>>, vector<1x8x128xf32>
    %9 = vector.shape_cast %8 : vector<1x8x128xf32> to vector<8x128xf32>
    %c3 = arith.constant 3 : index
    %c0_9 = arith.constant 0 : index
    %c0_10 = arith.constant 0 : index
    %10 = vector.load %arg2[%c3, %c0_9, %c0_10] : memref<4x8x128xf32, #tpu.memory_space<vmem>>, vector<1x8x128xf32>
    %11 = vector.shape_cast %10 : vector<1x8x128xf32> to vector<8x128xf32>
    %12 = arith.maximumf %5, %7 : vector<8x128xf32>
    %13 = arith.maximumf %12, %9 : vector<8x128xf32>
    %14 = arith.maximumf %13, %11 : vector<8x128xf32>
    %15 = arith.subf %5, %14 : vector<8x128xf32>
    %16 = math.exp %15 : vector<8x128xf32>
    %17 = arith.subf %7, %14 : vector<8x128xf32>
    %18 = math.exp %17 : vector<8x128xf32>
    %19 = arith.subf %9, %14 : vector<8x128xf32>
    %20 = math.exp %19 : vector<8x128xf32>
    %21 = arith.subf %11, %14 : vector<8x128xf32>
    %22 = math.exp %21 : vector<8x128xf32>
    %23 = arith.addf %16, %18 : vector<8x128xf32>
    %24 = arith.addf %23, %20 : vector<8x128xf32>
    %25 = arith.addf %24, %22 : vector<8x128xf32>
    %26 = tpu.reciprocal %25 {approx = true} : vector<8x128xf32> -> vector<8x128xf32>
    %27 = arith.mulf %25, %26 : vector<8x128xf32>
    %cst = arith.constant 2.000000e+00 : f32
    %28 = vector.broadcast %cst : f32 to vector<8x128xf32>
    %29 = arith.subf %28, %27 : vector<8x128xf32>
    %30 = arith.mulf %26, %29 : vector<8x128xf32>
    %31 = arith.mulf %16, %30 : vector<8x128xf32>
    %32 = arith.mulf %18, %30 : vector<8x128xf32>
    %33 = arith.mulf %20, %30 : vector<8x128xf32>
    %34 = arith.mulf %22, %30 : vector<8x128xf32>
    %35 = arith.mulf %32, %32 : vector<8x128xf32>
    %36 = arith.mulf %33, %33 : vector<8x128xf32>
    %37 = arith.mulf %34, %34 : vector<8x128xf32>
    %c0_i32_11 = arith.constant 0 : i32
    %38 = vector.broadcast %c0_i32_11 : i32 to vector<8x128xi32>
    %39 = arith.cmpi eq, %3, %38 : vector<8x128xi32>
    %c1_i32 = arith.constant 1 : i32
    %40 = vector.broadcast %c1_i32 : i32 to vector<8x128xi32>
    %41 = arith.cmpi eq, %3, %40 : vector<8x128xi32>
    %c2_i32 = arith.constant 2 : i32
    %42 = vector.broadcast %c2_i32 : i32 to vector<8x128xi32>
    %43 = arith.cmpi eq, %3, %42 : vector<8x128xi32>
    %44 = arith.ori %39, %41 : vector<8x128xi1>
    %45 = arith.ori %44, %43 : vector<8x128xi1>
    %cst_12 = arith.constant dense<true> : vector<8x128xi1>
    %46 = arith.xori %45, %cst_12 : vector<8x128xi1>
    %cst_13 = arith.constant 1.000000e+00 : f32
    %47 = vector.broadcast %cst_13 : f32 to vector<8x128xf32>
    %48 = arith.subf %31, %47 : vector<8x128xf32>
    %49 = arith.mulf %48, %48 : vector<8x128xf32>
    %cst_14 = arith.constant 0.000000e+00 : f32
    %50 = vector.broadcast %cst_14 : f32 to vector<8x128xf32>
    %51 = arith.select %39, %49, %50 : vector<8x128xi1>, vector<8x128xf32>
    %52 = arith.addf %35, %36 : vector<8x128xf32>
    %53 = arith.addf %52, %37 : vector<8x128xf32>
    %cst_15 = arith.constant 0.000000e+00 : f32
    %54 = vector.broadcast %cst_15 : f32 to vector<8x128xf32>
    %55 = arith.select %41, %35, %54 : vector<8x128xi1>, vector<8x128xf32>
    %56 = arith.subf %53, %55 : vector<8x128xf32>
    %cst_16 = arith.constant 0.000000e+00 : f32
    %57 = vector.broadcast %cst_16 : f32 to vector<8x128xf32>
    %58 = arith.select %43, %36, %57 : vector<8x128xi1>, vector<8x128xf32>
    %59 = arith.subf %56, %58 : vector<8x128xf32>
    %cst_17 = arith.constant 0.000000e+00 : f32
    %60 = vector.broadcast %cst_17 : f32 to vector<8x128xf32>
    %61 = arith.select %46, %37, %60 : vector<8x128xi1>, vector<8x128xf32>
    %62 = arith.subf %59, %61 : vector<8x128xf32>
    %c0_18 = arith.constant 0 : index
    %c0_19 = arith.constant 0 : index
    %c0_20 = arith.constant 0 : index
    %63 = vector.load %arg4[%c0_18, %c0_19, %c0_20] : memref<1x8x128xf32, #tpu.memory_space<vmem>>, vector<1x8x128xf32>
    %64 = vector.shape_cast %62 : vector<8x128xf32> to vector<1x8x128xf32>
    %cst_21 = arith.constant dense<0.000000e+00> : vector<8x128xf32>
    %65 = vector.multi_reduction <add>, %64, %cst_21 [0] : vector<1x8x128xf32> to vector<8x128xf32>
    %66 = vector.shape_cast %65 : vector<8x128xf32> to vector<1x8x128xf32>
    %67 = arith.addf %63, %66 : vector<1x8x128xf32>
    %c0_22 = arith.constant 0 : index
    %c0_23 = arith.constant 0 : index
    %c0_24 = arith.constant 0 : index
    %68 = vector.load %arg4[%c0_22, %c0_23, %c0_24] : memref<1x8x128xf32, #tpu.memory_space<vmem>>, vector<1x8x128xf32>
    tpu.vector_store %arg4[%c0_22, %c0_23, %c0_24], %67 {strides = array<i32>} : memref<1x8x128xf32, #tpu.memory_space<vmem>>, vector<1x8x128xf32>,
    %c0_25 = arith.constant 0 : index
    %c0_26 = arith.constant 0 : index
    %c0_27 = arith.constant 0 : index
    %69 = vector.load %arg5[%c0_25, %c0_26, %c0_27] : memref<1x8x128xf32, #tpu.memory_space<vmem>>, vector<1x8x128xf32>
    %70 = vector.shape_cast %51 : vector<8x128xf32> to vector<1x8x128xf32>
    %cst_28 = arith.constant dense<0.000000e+00> : vector<8x128xf32>
    %71 = vector.multi_reduction <add>, %70, %cst_28 [0] : vector<1x8x128xf32> to vector<8x128xf32>
    %72 = vector.shape_cast %71 : vector<8x128xf32> to vector<1x8x128xf32>
    %73 = arith.addf %69, %72 : vector<1x8x128xf32>
    %c0_29 = arith.constant 0 : index
    %c0_30 = arith.constant 0 : index
    %c0_31 = arith.constant 0 : index
    %74 = vector.load %arg5[%c0_29, %c0_30, %c0_31] : memref<1x8x128xf32, #tpu.memory_space<vmem>>, vector<1x8x128xf32>
    tpu.vector_store %arg5[%c0_29, %c0_30, %c0_31], %73 {strides = array<i32>} : memref<1x8x128xf32, #tpu.memory_space<vmem>>, vector<1x8x128xf32>,
    %c0_32 = arith.constant 0 : index
    %c0_33 = arith.constant 0 : index
    %c0_34 = arith.constant 0 : index
    %75 = vector.load %arg6[%c0_32, %c0_33, %c0_34] : memref<1x8x128xf32, #tpu.memory_space<vmem>>, vector<1x8x128xf32>
    %76 = arith.extui %39 : vector<8x128xi1> to vector<8x128xi32>
    %77 = arith.sitofp %76 : vector<8x128xi32> to vector<8x128xf32>
    %78 = vector.shape_cast %77 : vector<8x128xf32> to vector<1x8x128xf32>
    %cst_35 = arith.constant dense<0.000000e+00> : vector<8x128xf32>
    %79 = vector.multi_reduction <add>, %78, %cst_35 [0] : vector<1x8x128xf32> to vector<8x128xf32>
    %80 = vector.shape_cast %79 : vector<8x128xf32> to vector<1x8x128xf32>
    %81 = arith.addf %75, %80 : vector<1x8x128xf32>
    %c0_36 = arith.constant 0 : index
    %c0_37 = arith.constant 0 : index
    %c0_38 = arith.constant 0 : index
    %82 = vector.load %arg6[%c0_36, %c0_37, %c0_38] : memref<1x8x128xf32, #tpu.memory_space<vmem>>, vector<1x8x128xf32>
    tpu.vector_store %arg6[%c0_36, %c0_37, %c0_38], %81 {strides = array<i32>} : memref<1x8x128xf32, #tpu.memory_space<vmem>>, vector<1x8x128xf32>,
    return
  }
  func.func @transform_0(%arg0: i32, %arg1: i32) -> (i32, i32, i32) {
    %c2_i32 = arith.constant 2 : i32
    %0 = arith.muli %arg0, %c2_i32 : i32
    %1 = arith.addi %0, %arg1 : i32
    %c0_i32 = arith.constant 0 : i32
    %c0_i32_0 = arith.constant 0 : i32
    %c0_i32_1 = arith.constant 0 : i32
    return %c0_i32, %1, %c0_i32_0 : i32, i32, i32
  }
  func.func @transform_1(%arg0: i32, %arg1: i32) -> (i32, i32) {
    %c2_i32 = arith.constant 2 : i32
    %0 = arith.muli %arg0, %c2_i32 : i32
    %1 = arith.addi %0, %arg1 : i32
    %c0_i32 = arith.constant 0 : i32
    %c0_i32_0 = arith.constant 0 : i32
    return %1, %c0_i32 : i32, i32
  }
  func.func @transform_2(%arg0: i32, %arg1: i32) -> (i32, i32, i32) {
    %c0_i32 = arith.constant 0 : i32
    %c0_i32_0 = arith.constant 0 : i32
    %c0_i32_1 = arith.constant 0 : i32
    return %arg0, %c0_i32, %c0_i32_0 : i32, i32, i32
  }
  func.func @transform_3(%arg0: i32, %arg1: i32) -> (i32, i32, i32) {
    %c0_i32 = arith.constant 0 : i32
    %c0_i32_0 = arith.constant 0 : i32
    %c0_i32_1 = arith.constant 0 : i32
    return %arg0, %c0_i32, %c0_i32_0 : i32, i32, i32
  }
  func.func @transform_4(%arg0: i32, %arg1: i32) -> (i32, i32, i32) {
    %c0_i32 = arith.constant 0 : i32
    %c0_i32_0 = arith.constant 0 : i32
    %c0_i32_1 = arith.constant 0 : i32
    return %arg0, %c0_i32, %c0_i32_0 : i32, i32, i32
  }
}

</mosaic_0001>

<bundles_post_ra>
// kernel: tpu_custom_call.1
= control target key start
LH: loop header
LB: loop body
LE: loop exit
PB: predicated region body
PF: predicated region fallthrough
CT: control target
= control target key end

     0   :  { %s1372_s0 = inlined_call_operand.hbm [shape: f32[4,32,128], index: 0, kind: input, shape index: {}]   ;;  %s1373_s1 = inlined_call_operand.hbm [shape: s32[32,128], index: 1, kind: input, shape index: {}]   ;;  %s1374_s2 = inlined_call_operand.hbm [shape: f32[2,8,128], index: 2, kind: output, shape index: {0}]   ;;  %s1375_s3 = inlined_call_operand.hbm [shape: f32[2,8,128], index: 3, kind: output, shape index: {1}]   ;;  %s1376_s4 = inlined_call_operand.hbm [shape: f32[2,8,128], index: 4, kind: output, shape index: {2}]  }
   0x1   :  { %1387 = sst [smem:[#allocation25_spill]] %s1372_s0 }
   0x2   :  { %10 = vsyncpa [#allocation3], 0 }
   0x3   :  { %12 = vsyncpa [#allocation3 + $0x1], 0 }
   0x4   :  { %13 = vsyncpa [#allocation6], 0 }
   0x5   :  { %15 = vsyncpa [#allocation6 + $0x1], 0 }
   0x6   :  { %16 = vsyncpa [#allocation4], 0 }
   0x7   :  { %18 = vsyncpa [#allocation4 + $0x1], 0 }
   0x8   :  { %19 = vsyncpa [#allocation9], 0 }
   0x9   :  { %21 = vsyncpa [#allocation9 + $0x1], 0  ;;  %s1033_s15 = smov 0   ;;  %s1035_s16 = smov 0  }
   0xa   :  { %s1037_s17 = smov 0   ;;  %s1039_s18 = smov 0  }
   0xb   :  { %s1041_s19 = smov 0   ;;  %s1043_s20 = smov 0  }
   0xc   :  { %s1045_s21 = smov 0   ;;  %s1047_s22 = smov 0  }
   0xd   :  { %s1049_s23 = smov 0   ;;  %s1051_s24 = smov 0  }
   0xe   :  { %s1053_s25 = smov 0  }
   0xf LB: > { %1388 = sst [smem:[#allocation15_spill]] %s955_s15  ;;  %s1087_s26 = sadd.s32 4294967295, %s995_s25   ;;  %s995_s25 = sphi %s1053_s25, %s27_s25   ;;  %s991_s24 = sphi %s1051_s24, %s1418_s24   ;;  %s987_s23 = sphi %s1049_s23, %s1417_s23   ;;  %s983_s22 = sphi %s1047_s22, %s1416_s22   ;;  %s979_s21 = sphi %s1045_s21, %s1415_s21   ;;  %s975_s20 = sphi %s1043_s20, %s1414_s20   ;;  %s971_s19 = sphi %s1041_s19, %s1422_s19   ;;  %s967_s18 = sphi %s1039_s18, %s1421_s18   ;;  %s963_s17 = sphi %s1037_s17, %s1412_s17   ;;  %s959_s16 = sphi %s1035_s16, %s1420_s16   ;;  %s955_s15 = sphi %s1033_s15, %s1419_s15  }
  0x10   : > { %1389 = sst [smem:[#allocation16_spill]] %s963_s17  ;;  %s1380_s27 = sadd.s32 4294967294, %s995_s25  }
  0x11   : > { %1390 = sst [smem:[#allocation17_spill]] %s975_s20  ;;  %s36_s28 = sadd.s32 1, %s987_s23 }
  0x12   : > { %1391 = sst [smem:[#allocation18_spill]] %s987_s23  ;;  %s39_s29 = sadd.s32 1, %s991_s24 }
  0x13   : > { %1392 = sst [smem:[#allocation19_spill]] %s991_s24  ;;  %p37_p0 = scmp.ge.s32.totalorder %s36_s28, 2 }
  0x14   : > { %s594_s30 = sshll.u32 %s991_s24, 1  ;;  %s50_s6 = sadd.s32 1, %s975_s20 }
  0x15   : > { %s1094_s5 = sadd.s32 %s987_s23, %s594_s30  ;;  %s1424_s28 = smov (%p37_p0, %s36_s28), 0 }
  0x16   : > { %1393 = sst [smem:[#allocation20_spill]] %s1424_s28  ;;  %s1426_s29 = smov (!%p37_p0, %s39_s29), %s991_s24 }
  0x17   : > { %p57_p1 = scmp.ne.s32.totalorder %s975_s20, %s971_s19  ;;  %p58_p2 = scmp.eq.s32.totalorder %s995_s25, 0 }
  0x18   : > { %p41_p3 = scmp.ge.s32.totalorder %s1426_s29, 2  ;;  %p63_p4 = scmp.ne.s32.totalorder %s971_s19, %s967_s18 }
  0x19   : > { %p1104_p5 = por %p58_p2, %p57_p1  ;;  %p64_p6 = scmp.eq.s32.totalorder %s1087_s26, 0 }
  0x1a   : > { %s1428_s29 = smov (%p41_p3, %s1426_s29), 0  ;;  %s106_s9 = sadd.s32 1, %s963_s17 }
  0x1b   : > { %1395 = sst [smem:[#allocation21_spill]] %s1428_s29  ;;  %p1111_p7 = por %p64_p6, %p63_p4 }
  0x1c   : > { %s595_s10 = sshll.u32 %s1428_s29, 1  ;;  %s103_s11 = ssub.s32 %s991_s24, %s1428_s29 }
  0x1d   : > { %s46_s12 = sadd.s32 %s595_s10, %s1424_s28  ;;  %p104_p8 = scmp.eq.s32.totalorder %s103_s11, 0 }
  0x1e   : > { %s47_s13 = ssub.s32 %s1094_s5, %s46_s12  ;;  %p116_p9 = scmp.ne.s32.totalorder %s963_s17, %s959_s16 }
  0x1f   : > { %p48_p10 = scmp.eq.s32.totalorder %s47_s13, 0  ;;  %p117_p11 = scmp.eq.s32.totalorder %s1087_s26, 3 }
  0x20   : > { %s1125_s14 = scalar_select %p104_p8, %s963_s17, %s106_s9  }
  0x21   : > { %s1128_s18 = scalar_select %p48_p10, %s975_s20, %s50_s6  }
  0x22   : > { %1397 = sst [smem:[#allocation22_spill]] %s1125_s14  ;;  %p1130_p12 = por %p117_p11, %p116_p9 }
  0x23   : > { %1398 = sst [smem:[#allocation23_spill]] %s1128_s18  ;;  %p122_p13 = scmp.ne.s32.totalorder %s959_s16, %s955_s15 }
  0x24   : > { %p123_p0 = scmp.eq.s32.totalorder %s1380_s27, 3  ;;  %p653_p1 = scmp.lt.s32.totalorder %s995_s25, 4 }
  0x25   : > { %s1140_s10 = sand.u32 1, %s975_s20   ;;  %s1382_s12 = sshll.u32 %s1094_s5, 7 }
  0x26   : > { %p1142_p2 = por %p123_p0, %p122_p13  ;;  %s600_s9 = sshll.u32 %s1140_s10, 5 }
  0x27   : > { %s1402_s0 = sld [smem:[#allocation25_spill]]  ;;  %s199_s28 = scalar_lea.vmem [#allocation2], %s600_s9 }
  0x28   : > { %s1400_s11 = scalar_select %p1142_p2, 1, 0 }
  0x29   : > { %s207_s24 = sshll.u32 %s199_s28, 4  ;;  %p1155_p3 = pnand %p653_p1, %p1104_p5  ;;  %s208_s24 = int_to_ptr.vmem [resolvable:$true] %s207_s24 }
  0x2a   : > { %1401 = sst [smem:[#allocation24_spill]] %s1400_s11  ;;  %p606_p4 = scmp.ge.s32.totalorder %s995_s25, 1 }
  0x2b   : > { %s196_s23 = scalar_lea.sflag [#allocation3], %s1140_s10  ;;  %p761_p6 = pneg %p1155_p3 }
  0x2c   : > { %s772_s18 = scalar_lea.vmem %s208_s24, 512  ;;  %s997_s9 = smov [#allocation2]  }
  0x2d   : > { %s206_s29 = scalar_lea.hbm %s1402_s0, %s1382_s12  ;;  %p773_p8 = scmp.ne.s32.totalorder %s208_s24, %s772_s18 }
  0x2e   : > { %s777_s28 = sshll.u32 %s997_s9, 4  ;;  %s778_s28 = int_to_ptr.vmem [resolvable:$false] %s777_s28 }
  0x2f   : > { %p775_p9 = pnand %p773_p8, %p761_p6  ;;  %s779_s7 = scalar_lea.vmem %s778_s28, 1024 }
  0x30   : > { %p780_p5 = scmp.lt.s32.totalorder %s208_s24, %s778_s28  ;;  %p781_p11 = scmp.lt.s32.totalorder %s779_s7, %s772_s18 }
  0x31   : > { %p776_p10 = pneg %p775_p9 }
  0x32   : > { %p782_p13 = por %p781_p11, %p780_p5 }
  0x34   : > { %p783_p0 = pnand %p782_p13, %p776_p10 }
  0x36   : > { %786 = shalt.err (!%p783_p0)
}
  0x37   : > { %s998_s6 = smov 512   ;;  %s999_s13 = smov 128  }
  0x38   : > { %s1000_s12 = smov 8   ;;  %p235_p1 = scmp.lt.s32.totalorder %s995_s25, 5 }
  0x39   : > { %639 = dma.hbm_to_vmem [thread:$0]  (!%p1155_p3), %s206_s29, 512, %s208_s24, %s196_s23, %s998_s6, %s999_s13, %s1000_s12  }
  0x3a   : > { %s603_s9 = sshll.u32 %s1140_s10, 3  ;;  %s1404_s0 = sshll.u32 %s1094_s5, 7 }
  0x3b   : > { %s228_s7 = scalar_lea.hbm %s1373_s1, %s1404_s0  ;;  %p1177_p8 = pnand %p606_p4, %p235_p1 }
  0x3c   : > { %s221_s14 = scalar_lea.vmem [#allocation5], %s603_s9  ;;  %s218_s11 = scalar_lea.sflag [#allocation6], %s1140_s10 }
  0x3d   : > { %s230_s17 = sshll.u32 %s221_s14, 4  ;;  %s1001_s23 = smov [#allocation5]   ;;  %s231_s17 = int_to_ptr.vmem [resolvable:$true] %s230_s17 }
  0x3e   : > { %s800_s15 = scalar_lea.vmem %s231_s17, 128  ;;  %s805_s24 = sshll.u32 %s1001_s23, 4  ;;  %s806_s24 = int_to_ptr.vmem [resolvable:$false] %s805_s24 }
  0x3f   : > { %p801_p9 = scmp.ne.s32.totalorder %s231_s17, %s800_s15  ;;  %s807_s29 = scalar_lea.vmem %s806_s24, 256 }
  0x40   : > { %p808_p11 = scmp.lt.s32.totalorder %s231_s17, %s806_s24  ;;  %p809_p13 = scmp.lt.s32.totalorder %s807_s29, %s800_s15 }
  0x41   : > { %p803_p10 = pnand %p801_p9, %p761_p6 }
  0x42   : > { %p810_p4 = por %p809_p13, %p808_p11 }
  0x43   : > { %p804_p5 = pneg %p803_p10 }
  0x45   : > { %p811_p0 = pnand %p810_p4, %p804_p5 }
  0x47   : > { %814 = shalt.err (!%p811_p0)
}
  0x48   : > { %642 = dma.hbm_to_vmem [thread:$0]  (!%p1155_p3), %s228_s7, 128, %s231_s17, %s218_s11  }
  0x49   : > { %239 = sbr.rel (%p1177_p8) target bundleno = 212 (0xd4), region = 28  ;;  %s241_s0 = sand.u32 (!%p1177_p8), 1, %s971_s19  }
  0x4a   : > { %s607_s5 = sshll.u32 (!%p1177_p8), %s241_s0, 5  ;;  %s242_s14 = scalar_lea.sflag (!%p1177_p8), [#allocation3], %s241_s0 }
  0x4b   : > { %s245_s10 = scalar_lea.vmem (!%p1177_p8), [#allocation2], %s607_s5 }
  0x4e   : > { %938 = dma.done.wait (%p1111_p7), %s242_s14, 512  }
  0x4f   : > { %940 = vsyncadd (%p1111_p7), %s242_s14, 4294966784  ;;  %s608_s15 = sshll.u32 %s241_s0, 3  ;;  %s251_s12 = scalar_lea.sflag [#allocation6], %s241_s0 }
  0x50   : > { %s254_s6 = scalar_lea.vmem [#allocation5], %s608_s15 }
  0x51   : > { %942 = dma.done.wait (%p1111_p7), %s251_s12, 128  }
  0x52   : > { %944 = vsyncadd (%p1111_p7), %s251_s12, 4294967168  ;;  %s277_s17 = sand.u32 1, %s959_s16   ;;  %p612_p3 = scmp.ne.s32.totalorder %s979_s21, 0 }
  0x53   : > { %s609_s20 = sshll.u32 %s277_s17, 3 }
  0x54   : > { %s1201_s27 = scalar_lea.vmem [#allocation7], %s609_s20  ;;  %s1203_s11 = scalar_lea.vmem [#allocation8], %s609_s20 }
  0x55   : > { %s1205_s13 = scalar_lea.vmem [#allocation10], %s609_s20  ;;  %301 = sbr.rel (%p612_p3) target bundleno = 93 (0x5d), region = 40 }
  0x5a   : > { %v1002_v0 = vmov 0.0  }
  0x5b   : > { %302 = vst [vmem:[%s1201_s27] sm:$0xff] %v1002_v0  ;;  %303 = vst [vmem:[%s1203_s11] sm:$0xff] %v1002_v0 }
  0x5c   : > { %304 = vst [vmem:[%s1205_s13] sm:$0xff] %v1002_v0 }
  0x5d PF: > { %v1211_v1 = vld [vmem:[%s254_s6] sm:$0xff]  ;;  %v614_v4 = vld [vmem:[%s245_s10 + $0x10] sm:$0xff]  ;;  %v615_v6 = vld [vmem:[%s245_s10 + $0x18] sm:$0xff]  ;;  %v1003_v8 = vmov 0.0   ;;  %s378_s21 = sand.u32 1, %s1087_s26   ;;  %s1231_s8 = sshll.u32 %s983_s22, 7 }
  0x5e   : > { %v306_v2 = vld [vmem:[%s245_s10] sm:$0xff]  ;;  %v613_v3 = vld [vmem:[%s245_s10 + $0x8] sm:$0xff]  ;;  %vm342_vm0 = vcmp.eq.s32.totalorder %v1211_v1, 0  ;;  %vm343_vm1 = vcmp.eq.s32.totalorder %v1211_v1, 1  ;;  %vm344_vm2 = vcmp.eq.s32.totalorder %v1211_v1, 2  ;;  %s410_s9 = sshll.u32 %s1203_s11, 4  ;;  %s1250_s18 = scalar_lea.hbm %s1375_s3, %s1231_s8  ;;  %s1252_s9 = int_to_ptr.vmem [resolvable:$true] %s410_s9 }
  0x5f   : > { %v313_v5 = vmax.f32 %v306_v2, %v613_v3  ;;  %v617_v9 = vsel %vm342_vm0, 1.0, %v1003_v8  ;;  %vm345_vm3 = vmor %vm342_vm0, %vm343_vm1  ;;  %s423_s28 = sshll.u32 %s1205_s13, 4  ;;  %vm1004_vm5 = vmmov 1   ;;  %s1258_s24 = scalar_lea.hbm %s1376_s4, %s1231_s8  ;;  %s1260_s28 = int_to_ptr.vmem [resolvable:$true] %s423_s28 }
  0x60   : > { %vm346_vm4 = vmor %vm345_vm3, %vm344_vm2  ;;  %s397_s29 = sshll.u32 %s1201_s27, 4  ;;  %s1267_s0 = scalar_lea.sflag [#allocation9], %s378_s21  ;;  %s398_s29 = int_to_ptr.vmem [resolvable:$true] %s397_s29 }
  0x61   : > { %v314_v10 = vmax.f32 %v313_v5, %v614_v4  ;;  %vm1239_vm6 = vmxor %vm346_vm4, %vm1004_vm5  ;;  %s815_s5 = scalar_lea.vmem %s1252_s9, 128  ;;  %s1005_s14 = smov [#allocation8]  }
  0x62   : > { %v363_v41 = vld [vmem:[%s1203_s11] sm:$0xff]  ;;  %p816_p7 = scmp.ne.s32.totalorder %s1252_s9, %s815_s5  ;;  %s819_s10 = sshll.u32 %s1005_s14, 4  ;;  %s820_s10 = int_to_ptr.vmem [resolvable:$false] %s819_s10 }
  0x63   : > { %v367_v7 = vld [vmem:[%s1205_s13] sm:$0xff]  ;;  %v315_v12 = vmax.f32 %v314_v10, %v615_v6  ;;  %s821_s15 = scalar_lea.vmem %s820_s10, 256  ;;  %p822_p8 = scmp.lt.s32.totalorder %s1252_s9, %s820_s10 }
  0x64   : > { %v371_v11 = vadd.f32 %v617_v9, %v367_v7  ;;  %p817_p6 = pnand %p816_p7, %p1130_p12  ;;  %p823_p9 = scmp.lt.s32.totalorder %s821_s15, %s815_s5 }
  0x65   : > { %v316_v13 = vsub.f32 %v306_v2, %v315_v12  ;;  %v319_v14 = vsub.f32 %v613_v3, %v315_v12  ;;  %v322_v15 = vsub.f32 %v614_v4, %v315_v12  ;;  %v325_v16 = vsub.f32 %v615_v6, %v315_v12 }
  0x66   : > { %372 = vst [vmem:[%s1205_s13] sm:$0xff] %v371_v11  ;;  %p818_p1 = pneg %p817_p6  ;;  %p824_p10 = por %p823_p9, %p822_p8 }
  0x67   : > { %v317_v17 = vmul.f32 1.442695, %v316_v13  ;;  %v320_v18 = vmul.f32 1.442695, %v319_v14  ;;  %v323_v19 = vmul.f32 1.442695, %v322_v15 }
  0x68   : > { %v326_v20 = vmul.f32 1.442695, %v325_v16  ;;  %p825_p5 = pnand %p824_p10, %p818_p1 }
  0x69   : > { %749 = vpow2.f32 %v317_v17 }
  0x6a   : > { %751 = vpow2.f32 %v320_v18 }
  0x6b   : > { %753 = vpow2.f32 %v323_v19 }
  0x6c   : > { %755 = vpow2.f32 %v326_v20 }
  0x76   : > { %v750_v21 = vpop.eup %749 }
  0x77   : > { %v752_v22 = vpop.eup %751 }
  0x78   : > { %v754_v23 = vpop.eup %753  ;;  %v328_v24 = vadd.f32 %v752_v22, %v750_v21 }
  0x79   : > { %v756_v25 = vpop.eup %755 }
  0x7a   : > { %v329_v26 = vadd.f32 %v754_v23, %v328_v24 }
  0x7c   : > { %v330_v27 = vadd.f32 %v756_v25, %v329_v26 }
  0x7e   : > { %757 = vrcp.f32 %v330_v27 }
  0x8b   : > { %v758_v28 = vpop.eup %757 }
  0x8c   : > { %v332_v29 = vmul.f32 %v758_v28, %v330_v27 }
  0x8e   : > { %v333_v30 = vsub.f32 2.0, %v332_v29 }
  0x90   : > { %v334_v31 = vmul.f32 %v758_v28, %v333_v30 }
  0x92   : > { %v335_v32 = vmul.f32 %v750_v21, %v334_v31  ;;  %v336_v33 = vmul.f32 %v752_v22, %v334_v31  ;;  %v337_v34 = vmul.f32 %v754_v23, %v334_v31  ;;  %v338_v35 = vmul.f32 %v756_v25, %v334_v31 }
  0x94   : > { %v616_v36 = vadd.f32 -1.0, %v335_v32  ;;  %v339_v37 = vmul.f32 %v336_v33, %v336_v33  ;;  %v340_v38 = vmul.f32 %v337_v34, %v337_v34  ;;  %v1224_v39 = vmul.f32 %v338_v35, %v338_v35 }
  0x96   : > { %v349_v40 = vmul.f32 %v616_v36, %v616_v36  ;;  %v351_v42 = vadd.f32 %v340_v38, %v339_v37  ;;  %v353_v43 = vsel %vm343_vm1, %v339_v37, 0.0  ;;  %v355_v48 = vsel %vm344_vm2, %v340_v38, 0.0 }
  0x97   : > { %v357_v50 = vsel %vm1239_vm6, %v1224_v39, 0.0 }
  0x98   : > { %v350_v44 = vsel %vm342_vm0, %v349_v40, 0.0  ;;  %v352_v46 = vadd.f32 %v351_v42, %v1224_v39 }
  0x99   : > { %v365_v47 = vadd.f32 %v363_v41, %v350_v44 }
  0x9a   : > { %v354_v49 = vsub.f32 %v352_v46, %v353_v43 }
  0x9b   : > { %366 = vst [vmem:[%s1203_s11] sm:$0xff] %v365_v47 }
  0x9c   : > { %v356_v51 = vsub.f32 %v354_v49, %v355_v48 }
  0x9d   : > { %828 = shalt.err (!%p825_p5)
}
  0x9e   : > { %s829_s12 = scalar_lea.hbm %s1250_s18, 128  ;;  %s833_s11 = scalar_lea.hbm %s1375_s3, 256 }
  0x9f   : > { %p830_p11 = scmp.ne.s32.totalorder %s1250_s18, %s829_s12  ;;  %p834_p0 = scmp.lt.s32.totalorder %s1250_s18, %s1375_s3 }
  0xa0   : > { %p835_p3 = scmp.lt.s32.totalorder %s833_s11, %s829_s12 }
  0xa1   : > { %p831_p13 = pnand %p830_p11, %p1130_p12 }
  0xa2   : > { %p836_p7 = por %p835_p3, %p834_p0 }
  0xa3   : > { %p832_p4 = pneg %p831_p13 }
  0xa5   : > { %p837_p6 = pnand %p836_p7, %p832_p4 }
  0xa7   : > { %840 = shalt.err (!%p837_p6)
}
  0xa8   : > { %631 = dma.vmem_to_hbm [thread:$0]  (%p1130_p12), %s1252_s9, 128, %s1250_s18, %s1267_s0   ;;  %v359_v52 = vld [vmem:[%s1201_s27] sm:$0xff] }
  0xa9   : > { %s841_s22 = scalar_lea.vmem %s1260_s28, 128  ;;  %s1006_s26 = smov [#allocation10]  }
  0xaa   : > { %p842_p1 = scmp.ne.s32.totalorder %s1260_s28, %s841_s22  ;;  %s845_s7 = sshll.u32 %s1006_s26, 4  ;;  %s846_s7 = int_to_ptr.vmem [resolvable:$false] %s845_s7 }
  0xab   : > { %s847_s23 = scalar_lea.vmem %s846_s7, 256  ;;  %p848_p10 = scmp.lt.s32.totalorder %s1260_s28, %s846_s7 }
  0xac   : > { %p843_p8 = pnand %p842_p1, %p1130_p12  ;;  %p849_p5 = scmp.lt.s32.totalorder %s847_s23, %s841_s22 }
  0xae   : > { %p844_p9 = pneg %p843_p8  ;;  %p850_p11 = por %p849_p5, %p848_p10 }
  0xb0   : > { %p851_p13 = pnand %p850_p11, %p844_p9 }
  0xb2   : > { %854 = shalt.err (!%p851_p13)
}
  0xb3   : > { %s855_s9 = scalar_lea.hbm %s1258_s24, 128  ;;  %s859_s14 = scalar_lea.hbm %s1376_s4, 256 }
  0xb4   : > { %p856_p4 = scmp.ne.s32.totalorder %s1258_s24, %s855_s9  ;;  %p860_p7 = scmp.lt.s32.totalorder %s1258_s24, %s1376_s4 }
  0xb5   : > { %p861_p6 = scmp.lt.s32.totalorder %s859_s14, %s855_s9 }
  0xb6   : > { %p857_p0 = pnand %p856_p4, %p1130_p12 }
  0xb7   : > { %p862_p1 = por %p861_p6, %p860_p7 }
  0xb8   : > { %p858_p3 = pneg %p857_p0 }
  0xba   : > { %p863_p8 = pnand %p862_p1, %p858_p3 }
  0xbc   : > { %866 = shalt.err (!%p863_p8)
}
  0xbd   : > { %632 = dma.vmem_to_hbm [thread:$0]  (%p1130_p12), %s1260_s28, 128, %s1258_s24, %s1267_s0   ;;  %v358_v53 = vsub.f32 %v356_v51, %v357_v50 }
  0xbe   : > { %s395_s20 = scalar_lea.hbm %s1374_s2, %s1231_s8  ;;  %s374_s11 = scalar_lea.sflag [#allocation4], %s277_s17 }
  0xbf   : > { %v361_v54 = vadd.f32 %v359_v52, %v358_v53  ;;  %s867_s13 = scalar_lea.vmem %s398_s29, 128  ;;  %s1007_s21 = smov [#allocation7]  }
  0xc0   : > { %p868_p9 = scmp.ne.s32.totalorder %s398_s29, %s867_s13  ;;  %s871_s22 = sshll.u32 %s1007_s21, 4  ;;  %s872_s22 = int_to_ptr.vmem [resolvable:$false] %s871_s22 }
  0xc1   : > { %362 = vst [vmem:[%s1201_s27] sm:$0xff] %v361_v54  ;;  %s873_s28 = scalar_lea.vmem %s872_s22, 256  ;;  %p874_p11 = scmp.lt.s32.totalorder %s398_s29, %s872_s22 }
  0xc2   : > { %p869_p10 = pnand %p868_p9, %p1130_p12  ;;  %p875_p13 = scmp.lt.s32.totalorder %s873_s28, %s867_s13 }
  0xc4   : > { %p870_p5 = pneg %p869_p10  ;;  %p876_p4 = por %p875_p13, %p874_p11 }
  0xc6   : > { %p877_p0 = pnand %p876_p4, %p870_p5 }
  0xc8   : > { %880 = shalt.err (!%p877_p0)
}
  0xc9   : > { %s881_s8 = scalar_lea.hbm %s395_s20, 128  ;;  %s885_s24 = scalar_lea.hbm %s1374_s2, 256 }
  0xca   : > { %p882_p3 = scmp.ne.s32.totalorder %s395_s20, %s881_s8  ;;  %p886_p1 = scmp.lt.s32.totalorder %s395_s20, %s1374_s2 }
  0xcb   : > { %p887_p8 = scmp.lt.s32.totalorder %s885_s24, %s881_s8 }
  0xcc   : > { %p883_p7 = pnand %p882_p3, %p1130_p12 }
  0xcd   : > { %p888_p9 = por %p887_p8, %p886_p1 }
  0xce   : > { %p884_p6 = pneg %p883_p7 }
  0xd0   : > { %p889_p10 = pnand %p888_p9, %p884_p6 }
  0xd2   : > { %892 = shalt.err (!%p889_p10)
}
  0xd3   : > { %630 = dma.vmem_to_hbm [thread:$0]  (%p1130_p12), %s398_s29, 128, %s395_s20, %s374_s11  }
  0xd4 PF: > { %s1408_s7 = sld [smem:[#allocation15_spill]]  ;;  %p654_p5 = scmp.ge.s32.totalorder %s995_s25, 2 }
  0xd6   : > { %p644_p11 = pnand %p654_p5, %p1142_p2 }
  0xd8   : > { %p645_p13 = pneg %p644_p11 }
  0xda   : > { %s435_s9 = sand.u32 1, %s1408_s7  }
  0xdb   : > { %s436_s18 = scalar_lea.sflag [#allocation4], %s435_s9 }
  0xdc   : > { %946 = dma.done.wait (%p645_p13), %s436_s18, 128  }
  0xdd   : > { %948 = vsyncadd (%p645_p13), %s436_s18, 4294967168  ;;  %s1410_s5 = sadd.s32 4294967294, %s995_s25  }
  0xde   : > { %s444_s14 = sand.u32 1, %s1410_s5  }
  0xdf   : > { %s445_s10 = scalar_lea.sflag [#allocation9], %s444_s14 }
  0xe0   : > { %950 = dma.done.wait (%p645_p13), %s445_s10, 256  }
  0xe1   : > { %952 = vsyncadd (%p645_p13), %s445_s10, 4294967040  ;;  %s27_s25 = sadd.s32 1, %s995_s25   ;;  %s1411_s30 = sld [smem:[#allocation16_spill]] }
  0xe2   : > { %p24_p12 = scmp.ge.s32.totalorder %s27_s25, 6   ;;  %s1412_s17 = sld [smem:[#allocation22_spill]] }
  0xe3   : > { %s1413_s29 = sld [smem:[#allocation17_spill]]  ;;  %s1419_s15 = smov %s959_s16 }
  0xe4   : > { %s1414_s20 = sld [smem:[#allocation23_spill]]  ;;  %s1421_s18 = smov %s971_s19 }
  0xe5   : > { %s1415_s21 = sld [smem:[#allocation18_spill]]  ;;  %26 = sbr.rel (!%p24_p12) target bundleno = 15 (0xf), region = 125 }
  0xe6   : > { %s1416_s22 = sld [smem:[#allocation19_spill]] }
  0xe7   : > { %s1417_s23 = sld [smem:[#allocation20_spill]]  ;;  %s1420_s16 = smov %s1411_s30 }
  0xe8   : > { %s1418_s24 = sld [smem:[#allocation21_spill]] }
  0xe9   : > { %s1422_s19 = smov %s1413_s29 }
  0xea   :  { %459 = vsyncpa [#allocation3], 1 }
  0xeb   :  { %461 = vsyncpa [#allocation3 + $0x1], 1 }
  0xec   :  { %462 = vsyncpa [#allocation6], 1 }
  0xed   :  { %464 = vsyncpa [#allocation6 + $0x1], 1 }
  0xee   :  { %465 = vsyncpa [#allocation4], 1 }
  0xef   :  { %467 = vsyncpa [#allocation4 + $0x1], 1 }
  0xf0   :  { %468 = vsyncpa [#allocation9], 1 }
  0xf1   :  { %470 = vsyncpa [#allocation9 + $0x1], 1 }

</bundles_post_ra>
